<compile_context>
chip_gen: v7x
topology: tpu7x:2x2x1
jax: 0.10.0
libtpu: 0.0.40
codegen_flags: <defaults>
</compile_context>

<pallas_src>
import jax
import jax.numpy as jnp
from jax import lax
from jax.experimental import pallas as pl
from jax.experimental.pallas import tpu as pltpu


def _dwconv_kernel(x_mid_ref, x_prev_ref, x_next_ref, w_ref, b_ref, o_ref):
    tile_h, W, Cp = x_mid_ref.shape[1], x_mid_ref.shape[2], x_mid_ref.shape[3]

    t = pl.program_id(1)
    n_t = pl.num_programs(1)

    mid = x_mid_ref[0].astype(jnp.float32)                          # (tile_h, W, Cp)
    # 1-row halos above / below this tile; zeroed at the image borders (zero padding).
    prev = x_prev_ref[0].astype(jnp.float32) * (t > 0).astype(jnp.float32)
    nxt = x_next_ref[0].astype(jnp.float32) * (t < n_t - 1).astype(jnp.float32)

    # Halo-extended tile: image rows [-1 .. tile_h] relative to this tile's first row.
    ext = jnp.concatenate([prev, mid, nxt], axis=0)                 # (tile_h + 2, W, Cp)

    wgt = w_ref[...]                                                # (9, Cp) f32
    col = lax.broadcasted_iota(jnp.int32, (1, W, 1), 1)             # hoisted column iota

    acc = jnp.zeros((tile_h, W, Cp), jnp.float32)
    for kj in range(3):                                             # horizontal taps
        shift = 1 - kj                                              # dw = kj - 1
        if shift == 0:
            sh = ext
        else:
            sh = pltpu.roll(ext, shift=shift % W, axis=1)           # sublane rotate (XLU)
            if shift > 0:                                           # zero the wrapped-in cols
                sh = jnp.where(col >= shift, sh, 0.0)
            else:
                sh = jnp.where(col < W + shift, sh, 0.0)
        for ki in range(3):                                         # vertical taps
            wtap = wgt[3 * ki + kj: 3 * ki + kj + 1, :]             # (1, Cp) -> lane bcast
            acc = acc + sh[ki:ki + tile_h] * wtap

    o_ref[0] = (acc + b_ref[...]).astype(o_ref.dtype)


def dwconv(x, weight, bias, H, W, *, tile_h=None, interpret=False):
    """Depthwise 3x3 conv over the (H, W) token grid of tokens-major x.

    x:      (B, N, C) with N = H * W (row-major over H, W)
    weight: (3, 3, C)   -- weight[ki, kj, c] == torch_conv.weight[c, 0, ki, kj]
    bias:   (C,)
    returns (B, N, C), same dtype as x.
    """
    B, N, C = x.shape
    assert N == H * W, "token count must equal H * W"

    LANE = 128
    Cp = ((C + LANE - 1) // LANE) * LANE
    pc = Cp - C
    if pc:                                   # lane-dense channel padding (wrapper-side)
        x = jnp.pad(x, ((0, 0), (0, 0), (0, pc)))
        weight = jnp.pad(weight, ((0, 0), (0, 0), (0, pc)))
        bias = jnp.pad(bias, ((0, pc),))

    x4 = x.reshape(B, H, W, Cp)
    wflat = weight.reshape(9, Cp).astype(jnp.float32)
    b2 = bias.reshape(1, Cp).astype(jnp.float32)

    itemsize = jnp.dtype(x.dtype).itemsize
    # Per-image-row VMEM footprint: 4 x-dtype tile rows (double-buffered in + out) plus
    # ~4 f32 temporaries (ext / rolled copy / acc) inside the kernel body.
    row_bytes = W * Cp * (4 * itemsize + 4 * 4)
    budget = 36 * 1024 * 1024                # leave headroom under v7x's 64 MiB VMEM
    if tile_h is None:
        budget_rows = max(1, budget // row_bytes)
        tile_h = 1
        for cand in range(1, H + 1):
            if H % cand == 0 and cand <= budget_rows:
                tile_h = cand                # largest divisor of H within budget
    assert H % tile_h == 0
    n_t = H // tile_h

    # Explicit VMEM budget: double-buffered in/out tiles + halos + weights + f32 temporaries.
    tile_x = tile_h * W * Cp * itemsize
    halo_x = W * Cp * itemsize
    tile_f32 = (tile_h + 2) * W * Cp * 4
    est = 4 * tile_x + 4 * halo_x + 4 * tile_f32 + 2 * 10 * Cp * 4 + (2 << 20)
    vmem_limit = int(min(48 * 1024 * 1024, max(16 * 1024 * 1024, est)))

    flops = 2 * 9 * B * H * W * Cp
    bytes_accessed = 2 * B * H * W * Cp * itemsize + 10 * Cp * 4

    def mid_map(b, t):
        return (b, t, 0, 0)

    def prev_map(b, t):
        return (b, jnp.maximum(t * tile_h - 1, 0), 0, 0)

    def next_map(b, t):
        return (b, jnp.minimum(t * tile_h + tile_h, H - 1), 0, 0)

    out = pl.pallas_call(
        _dwconv_kernel,
        out_shape=jax.ShapeDtypeStruct((B, H, W, Cp), x.dtype),
        grid=(B, n_t),
        in_specs=[
            pl.BlockSpec((1, tile_h, W, Cp), mid_map),   # main row tile
            pl.BlockSpec((1, 1, W, Cp), prev_map),       # 1-row halo above (clamped)
            pl.BlockSpec((1, 1, W, Cp), next_map),       # 1-row halo below (clamped)
            pl.BlockSpec((9, Cp), lambda b, t: (0, 0)),  # depthwise taps (stays resident)
            pl.BlockSpec((1, Cp), lambda b, t: (0, 0)),  # bias (stays resident)
        ],
        out_specs=pl.BlockSpec((1, tile_h, W, Cp), mid_map),
        compiler_params=pltpu.CompilerParams(
            dimension_semantics=("parallel", "parallel"),
            vmem_limit_bytes=vmem_limit,
        ),
        cost_estimate=pl.CostEstimate(flops=flops, transcendentals=0,
                                      bytes_accessed=bytes_accessed),
        interpret=interpret,
    )(x4, x4, x4, wflat, b2)

    out = out.reshape(B, N, Cp)
    return out[:, :, :C] if pc else out


def ref_dwconv(x, weight, bias, H, W):
    """Pure-JAX reference mirroring the PyTorch DWConv forward."""
    B, N, C = x.shape
    x4 = x.reshape(B, H, W, C)
    k = weight.reshape(3, 3, 1, C)                       # HWIO, groups=C
    y = lax.conv_general_dilated(
        x4, k, window_strides=(1, 1), padding="SAME",
        dimension_numbers=("NHWC", "HWIO", "NHWC"),
        feature_group_count=C) + bias
    return y.reshape(B, N, C)


if __name__ == "__main__":
    B, H, W, C = 2, 16, 16, 8
    N = H * W

    key = jax.random.PRNGKey(0)
    kx, kw, kb = jax.random.split(key, 3)
    x = jax.random.normal(kx, (B, N, C), jnp.float32)
    weight = jax.random.normal(kw, (3, 3, C), jnp.float32) * (1.0 / 3.0)
    bias = jax.random.normal(kb, (C,), jnp.float32) * 0.1

    # tile_h=4 -> 4 row tiles per image: exercises first / interior / last halo masking.
    out = dwconv(x, weight, bias, H, W, tile_h=4)
    out = jax.block_until_ready(out)

    ref = ref_dwconv(x, weight, bias, H, W)
    if not jnp.allclose(out, ref, rtol=1e-4, atol=1e-4):
        raise AssertionError("Pallas DWConv output mismatch vs reference")

    # Also exercise the auto tile_h path (single-tile-per-image case).
    out2 = jax.block_until_ready(dwconv(x, weight, bias, H, W))
    if not jnp.allclose(out2, ref, rtol=1e-4, atol=1e-4):
        raise AssertionError("Pallas DWConv (auto tile) mismatch vs reference")

    print("KERNEL_OK")
</pallas_src>

<mosaic_0001>
module attributes {stable_mosaic.version = 11 : i64} {
  func.func @_dwconv_kernel(%arg0: i32, %arg1: i32, %arg2: memref<1x4x16x128xf32, #tpu.memory_space<vmem>>, %arg3: memref<1x1x16x128xf32, #tpu.memory_space<vmem>>, %arg4: memref<1x1x16x128xf32, #tpu.memory_space<vmem>>, %arg5: memref<9x128xf32, #tpu.memory_space<vmem>>, %arg6: memref<1x128xf32, #tpu.memory_space<vmem>>, %arg7: memref<1x4x16x128xf32, #tpu.memory_space<vmem>>) attributes {dimension_semantics = [#tpu.dimension_semantics<parallel>, #tpu.dimension_semantics<parallel>], iteration_bounds = array<i64: 2, 4>, scalar_prefetch = 0 : i64, scratch_operands = 0 : i64, tpu.core_type = #tpu.core_type<tc>, window_params = [{transform_indices = @transform_0, window_bounds = array<i64: 1, 4, 16, 128>}, {transform_indices = @transform_1, window_bounds = array<i64: 1, 1, 16, 128>}, {transform_indices = @transform_2, window_bounds = array<i64: 1, 1, 16, 128>}, {pipeline_mode = #tpu.pipeline_mode<synchronous>, transform_indices = @transform_3, window_bounds = array<i64: 9, 128>}, {pipeline_mode = #tpu.pipeline_mode<synchronous>, transform_indices = @transform_4, window_bounds = array<i64: 1, 128>}, {transform_indices = @transform_5, window_bounds = array<i64: 1, 4, 16, 128>}]} {
    %c0 = arith.constant 0 : index
    %c0_0 = arith.constant 0 : index
    %c0_1 = arith.constant 0 : index
    %c0_2 = arith.constant 0 : index
    %0 = vector.load %arg2[%c0, %c0_0, %c0_1, %c0_2] : memref<1x4x16x128xf32, #tpu.memory_space<vmem>>, vector<1x4x16x128xf32>
    %1 = vector.shape_cast %0 : vector<1x4x16x128xf32> to vector<4x16x128xf32>
    %c0_3 = arith.constant 0 : index
    %c0_4 = arith.constant 0 : index
    %c0_5 = arith.constant 0 : index
    %c0_6 = arith.constant 0 : index
    %2 = vector.load %arg3[%c0_3, %c0_4, %c0_5, %c0_6] : memref<1x1x16x128xf32, #tpu.memory_space<vmem>>, vector<1x1x16x128xf32>
    %3 = vector.shape_cast %2 : vector<1x1x16x128xf32> to vector<1x16x128xf32>
    %c0_i32 = arith.constant 0 : i32
    %4 = arith.cmpi sgt, %arg1, %c0_i32 : i32
    %5 = arith.extui %4 : i1 to i32
    %6 = arith.sitofp %5 : i32 to f32
    %7 = vector.broadcast %6 : f32 to vector<1x16x128xf32>
    %8 = arith.mulf %3, %7 : vector<1x16x128xf32>
    %c0_7 = arith.constant 0 : index
    %c0_8 = arith.constant 0 : index
    %c0_9 = arith.constant 0 : index
    %c0_10 = arith.constant 0 : index
    %9 = vector.load %arg4[%c0_7, %c0_8, %c0_9, %c0_10] : memref<1x1x16x128xf32, #tpu.memory_space<vmem>>, vector<1x1x16x128xf32>
    %10 = vector.shape_cast %9 : vector<1x1x16x128xf32> to vector<1x16x128xf32>
    %c3_i32 = arith.constant 3 : i32
    %11 = arith.cmpi slt, %arg1, %c3_i32 : i32
    %12 = arith.extui %11 : i1 to i32
    %13 = arith.sitofp %12 : i32 to f32
    %14 = vector.broadcast %13 : f32 to vector<1x16x128xf32>
    %15 = arith.mulf %10, %14 : vector<1x16x128xf32>
    %16 = tpu.concatenate %8, %1, %15 in 0 : vector<1x16x128xf32>, vector<4x16x128xf32>, vector<1x16x128xf32> -> vector<6x16x128xf32>
    %c0_11 = arith.constant 0 : index
    %c0_12 = arith.constant 0 : index
    %17 = vector.load %arg5[%c0_11, %c0_12] : memref<9x128xf32, #tpu.memory_space<vmem>>, vector<9x128xf32>
    %18 = tpu.iota {dimensions = array<i32: 1>} : vector<1x16x1xi32>
    %cst = arith.constant 0.000000e+00 : f32
    %19 = vector.broadcast %cst : f32 to vector<4x16x128xf32>
    %c1_i32 = arith.constant 1 : i32
    %20 = tpu.dynamic_rotate %16 by %c1_i32 dim 1 : vector<6x16x128xf32>, i32 -> vector<6x16x128xf32>
    %c1_i32_13 = arith.constant 1 : i32
    %21 = vector.broadcast %c1_i32_13 : i32 to vector<1x16x1xi32>
    %22 = arith.cmpi sge, %18, %21 : vector<1x16x1xi32>
    %cst_14 = arith.constant 0.000000e+00 : f32
    %23 = vector.shape_cast %22 : vector<1x16x1xi1> to vector<1x16x1xi1>
    %24 = vector.broadcast %23 : vector<1x16x1xi1> to vector<6x16x128xi1>
    %25 = vector.broadcast %cst_14 : f32 to vector<6x16x128xf32>
    %26 = arith.select %24, %20, %25 : vector<6x16x128xi1>, vector<6x16x128xf32>
    %27 = vector.extract_strided_slice %17 {offsets = [0, 0], sizes = [1, 128], strides = [1, 1]} : vector<9x128xf32> to vector<1x128xf32>
    %28 = vector.extract_strided_slice %26 {offsets = [0, 0, 0], sizes = [4, 16, 128], strides = [1, 1, 1]} : vector<6x16x128xf32> to vector<4x16x128xf32>
    %29 = vector.shape_cast %27 : vector<1x128xf32> to vector<1x1x128xf32>
    %30 = vector.broadcast %29 : vector<1x1x128xf32> to vector<4x16x128xf32>
    %31 = arith.mulf %28, %30 : vector<4x16x128xf32>
    %32 = arith.addf %19, %31 : vector<4x16x128xf32>
    %33 = vector.extract_strided_slice %17 {offsets = [3, 0], sizes = [1, 128], strides = [1, 1]} : vector<9x128xf32> to vector<1x128xf32>
    %34 = vector.extract_strided_slice %26 {offsets = [1, 0, 0], sizes = [4, 16, 128], strides = [1, 1, 1]} : vector<6x16x128xf32> to vector<4x16x128xf32>
    %35 = vector.shape_cast %33 : vector<1x128xf32> to vector<1x1x128xf32>
    %36 = vector.broadcast %35 : vector<1x1x128xf32> to vector<4x16x128xf32>
    %37 = arith.mulf %34, %36 : vector<4x16x128xf32>
    %38 = arith.addf %32, %37 : vector<4x16x128xf32>
    %39 = vector.extract_strided_slice %17 {offsets = [6, 0], sizes = [1, 128], strides = [1, 1]} : vector<9x128xf32> to vector<1x128xf32>
    %40 = vector.extract_strided_slice %26 {offsets = [2, 0, 0], sizes = [4, 16, 128], strides = [1, 1, 1]} : vector<6x16x128xf32> to vector<4x16x128xf32>
    %41 = vector.shape_cast %39 : vector<1x128xf32> to vector<1x1x128xf32>
    %42 = vector.broadcast %41 : vector<1x1x128xf32> to vector<4x16x128xf32>
    %43 = arith.mulf %40, %42 : vector<4x16x128xf32>
    %44 = arith.addf %38, %43 : vector<4x16x128xf32>
    %45 = vector.extract_strided_slice %17 {offsets = [1, 0], sizes = [1, 128], strides = [1, 1]} : vector<9x128xf32> to vector<1x128xf32>
    %46 = vector.extract_strided_slice %16 {offsets = [0, 0, 0], sizes = [4, 16, 128], strides = [1, 1, 1]} : vector<6x16x128xf32> to vector<4x16x128xf32>
    %47 = vector.shape_cast %45 : vector<1x128xf32> to vector<1x1x128xf32>
    %48 = vector.broadcast %47 : vector<1x1x128xf32> to vector<4x16x128xf32>
    %49 = arith.mulf %46, %48 : vector<4x16x128xf32>
    %50 = arith.addf %44, %49 : vector<4x16x128xf32>
    %51 = vector.extract_strided_slice %17 {offsets = [4, 0], sizes = [1, 128], strides = [1, 1]} : vector<9x128xf32> to vector<1x128xf32>
    %52 = vector.extract_strided_slice %16 {offsets = [1, 0, 0], sizes = [4, 16, 128], strides = [1, 1, 1]} : vector<6x16x128xf32> to vector<4x16x128xf32>
    %53 = vector.shape_cast %51 : vector<1x128xf32> to vector<1x1x128xf32>
    %54 = vector.broadcast %53 : vector<1x1x128xf32> to vector<4x16x128xf32>
    %55 = arith.mulf %52, %54 : vector<4x16x128xf32>
    %56 = arith.addf %50, %55 : vector<4x16x128xf32>
    %57 = vector.extract_strided_slice %17 {offsets = [7, 0], sizes = [1, 128], strides = [1, 1]} : vector<9x128xf32> to vector<1x128xf32>
    %58 = vector.extract_strided_slice %16 {offsets = [2, 0, 0], sizes = [4, 16, 128], strides = [1, 1, 1]} : vector<6x16x128xf32> to vector<4x16x128xf32>
    %59 = vector.shape_cast %57 : vector<1x128xf32> to vector<1x1x128xf32>
    %60 = vector.broadcast %59 : vector<1x1x128xf32> to vector<4x16x128xf32>
    %61 = arith.mulf %58, %60 : vector<4x16x128xf32>
    %62 = arith.addf %56, %61 : vector<4x16x128xf32>
    %c15_i32 = arith.constant 15 : i32
    %63 = tpu.dynamic_rotate %16 by %c15_i32 dim 1 : vector<6x16x128xf32>, i32 -> vector<6x16x128xf32>
    %c15_i32_15 = arith.constant 15 : i32
    %64 = vector.broadcast %c15_i32_15 : i32 to vector<1x16x1xi32>
    %65 = arith.cmpi slt, %18, %64 : vector<1x16x1xi32>
    %cst_16 = arith.constant 0.000000e+00 : f32
    %66 = vector.shape_cast %65 : vector<1x16x1xi1> to vector<1x16x1xi1>
    %67 = vector.broadcast %66 : vector<1x16x1xi1> to vector<6x16x128xi1>
    %68 = vector.broadcast %cst_16 : f32 to vector<6x16x128xf32>
    %69 = arith.select %67, %63, %68 : vector<6x16x128xi1>, vector<6x16x128xf32>
    %70 = vector.extract_strided_slice %17 {offsets = [2, 0], sizes = [1, 128], strides = [1, 1]} : vector<9x128xf32> to vector<1x128xf32>
    %71 = vector.extract_strided_slice %69 {offsets = [0, 0, 0], sizes = [4, 16, 128], strides = [1, 1, 1]} : vector<6x16x128xf32> to vector<4x16x128xf32>
    %72 = vector.shape_cast %70 : vector<1x128xf32> to vector<1x1x128xf32>
    %73 = vector.broadcast %72 : vector<1x1x128xf32> to vector<4x16x128xf32>
    %74 = arith.mulf %71, %73 : vector<4x16x128xf32>
    %75 = arith.addf %62, %74 : vector<4x16x128xf32>
    %76 = vector.extract_strided_slice %17 {offsets = [5, 0], sizes = [1, 128], strides = [1, 1]} : vector<9x128xf32> to vector<1x128xf32>
    %77 = vector.extract_strided_slice %69 {offsets = [1, 0, 0], sizes = [4, 16, 128], strides = [1, 1, 1]} : vector<6x16x128xf32> to vector<4x16x128xf32>
    %78 = vector.shape_cast %76 : vector<1x128xf32> to vector<1x1x128xf32>
    %79 = vector.broadcast %78 : vector<1x1x128xf32> to vector<4x16x128xf32>
    %80 = arith.mulf %77, %79 : vector<4x16x128xf32>
    %81 = arith.addf %75, %80 : vector<4x16x128xf32>
    %82 = vector.extract_strided_slice %17 {offsets = [8, 0], sizes = [1, 128], strides = [1, 1]} : vector<9x128xf32> to vector<1x128xf32>
    %83 = vector.extract_strided_slice %69 {offsets = [2, 0, 0], sizes = [4, 16, 128], strides = [1, 1, 1]} : vector<6x16x128xf32> to vector<4x16x128xf32>
    %84 = vector.shape_cast %82 : vector<1x128xf32> to vector<1x1x128xf32>
    %85 = vector.broadcast %84 : vector<1x1x128xf32> to vector<4x16x128xf32>
    %86 = arith.mulf %83, %85 : vector<4x16x128xf32>
    %87 = arith.addf %81, %86 : vector<4x16x128xf32>
    %c0_17 = arith.constant 0 : index
    %c0_18 = arith.constant 0 : index
    %88 = vector.load %arg6[%c0_17, %c0_18] : memref<1x128xf32, #tpu.memory_space<vmem>>, vector<1x128xf32>
    %89 = vector.shape_cast %88 : vector<1x128xf32> to vector<1x1x128xf32>
    %90 = vector.broadcast %89 : vector<1x1x128xf32> to vector<4x16x128xf32>
    %91 = arith.addf %87, %90 : vector<4x16x128xf32>
    %c0_19 = arith.constant 0 : index
    %c0_20 = arith.constant 0 : index
    %c0_21 = arith.constant 0 : index
    %c0_22 = arith.constant 0 : index
    %92 = vector.load %arg7[%c0_19, %c0_20, %c0_21, %c0_22] : memref<1x4x16x128xf32, #tpu.memory_space<vmem>>, vector<1x4x16x128xf32>
    %93 = vector.shape_cast %92 : vector<1x4x16x128xf32> to vector<4x16x128xf32>
    %94 = vector.shape_cast %91 : vector<4x16x128xf32> to vector<1x4x16x128xf32>
    tpu.vector_store %arg7[%c0_19, %c0_20, %c0_21, %c0_22], %94 {strides = array<i32>} : memref<1x4x16x128xf32, #tpu.memory_space<vmem>>, vector<1x4x16x128xf32>,
    return
  }
  func.func @transform_0(%arg0: i32, %arg1: i32) -> (i32, i32, i32, i32) {
    %c0_i32 = arith.constant 0 : i32
    %c0_i32_0 = arith.constant 0 : i32
    %c0_i32_1 = arith.constant 0 : i32
    return %arg0, %arg1, %c0_i32, %c0_i32_0 : i32, i32, i32, i32
  }
  func.func @transform_1(%arg0: i32, %arg1: i32) -> (i32, i32, i32, i32) {
    %c4_i32 = arith.constant 4 : i32
    %0 = arith.muli %arg1, %c4_i32 : i32
    %c1_i32 = arith.constant 1 : i32
    %1 = arith.subi %0, %c1_i32 : i32
    %c0_i32 = arith.constant 0 : i32
    %2 = arith.maxsi %1, %c0_i32 : i32
    %c0_i32_0 = arith.constant 0 : i32
    %c0_i32_1 = arith.constant 0 : i32
    %c0_i32_2 = arith.constant 0 : i32
    return %arg0, %2, %c0_i32_0, %c0_i32_1 : i32, i32, i32, i32
  }
  func.func @transform_2(%arg0: i32, %arg1: i32) -> (i32, i32, i32, i32) {
    %c4_i32 = arith.constant 4 : i32
    %0 = arith.muli %arg1, %c4_i32 : i32
    %c4_i32_0 = arith.constant 4 : i32
    %1 = arith.addi %0, %c4_i32_0 : i32
    %c15_i32 = arith.constant 15 : i32
    %2 = arith.minsi %1, %c15_i32 : i32
    %c0_i32 = arith.constant 0 : i32
    %c0_i32_1 = arith.constant 0 : i32
    %c0_i32_2 = arith.constant 0 : i32
    return %arg0, %2, %c0_i32, %c0_i32_1 : i32, i32, i32, i32
  }
  func.func @transform_3(%arg0: i32, %arg1: i32) -> (i32, i32) {
    %c0_i32 = arith.constant 0 : i32
    %c0_i32_0 = arith.constant 0 : i32
    %c0_i32_1 = arith.constant 0 : i32
    return %c0_i32, %c0_i32_0 : i32, i32
  }
  func.func @transform_4(%arg0: i32, %arg1: i32) -> (i32, i32) {
    %c0_i32 = arith.constant 0 : i32
    %c0_i32_0 = arith.constant 0 : i32
    %c0_i32_1 = arith.constant 0 : i32
    return %c0_i32, %c0_i32_0 : i32, i32
  }
  func.func @transform_5(%arg0: i32, %arg1: i32) -> (i32, i32, i32, i32) {
    %c0_i32 = arith.constant 0 : i32
    %c0_i32_0 = arith.constant 0 : i32
    %c0_i32_1 = arith.constant 0 : i32
    return %arg0, %arg1, %c0_i32, %c0_i32_0 : i32, i32, i32, i32
  }
}

</mosaic_0001>

<bundles_post_ra>
// kernel: tpu_custom_call.1
= control target key start
LH: loop header
LB: loop body
LE: loop exit
PB: predicated region body
PF: predicated region fallthrough
CT: control target
= control target key end

     0   :  { %s2187_s0 = inlined_call_operand.hbm [shape: f32[2,16,16,128], index: 0, kind: input, shape index: {}]   ;;  %s2188_s1 = inlined_call_operand.hbm [shape: f32[2,16,16,128], index: 1, kind: input, shape index: {}]   ;;  %s2189_s2 = inlined_call_operand.hbm [shape: f32[2,16,16,128], index: 2, kind: input, shape index: {}]   ;;  %s2190_s3 = inlined_call_operand.hbm [shape: f32[9,128], index: 3, kind: input, shape index: {}]   ;;  %s2191_s4 = inlined_call_operand.vmem [shape: f32[1,128], index: 4, kind: input, shape index: {}]   ;;  %s2192_s5 = inlined_call_operand.hbm [shape: f32[2,16,16,128], index: 5, kind: output, shape index: {}]  }
   0x1   :  { %2219 = sst [smem:[#allocation32_spill]] %s2187_s0 }
   0x2   :  { %2220 = sst [smem:[#allocation33_spill]] %s2188_s1 }
   0x3   :  { %2221 = sst [smem:[#allocation34_spill]] %s2189_s2 }
   0x4   :  { %2222 = sst [smem:[#allocation35_spill]] %s2190_s3 }
   0x5   :  { %2223 = sst [smem:[#allocation36_spill]] %s2191_s4 }
   0x6   :  { %2224 = sst [smem:[#allocation37_spill]] %s2192_s5 }
   0x7   :  { %10 = vsyncpa [#allocation3], 0 }
   0x8   :  { %12 = vsyncpa [#allocation3 + $0x1], 0 }
   0x9   :  { %13 = vsyncpa [#allocation6], 0 }
   0xa   :  { %15 = vsyncpa [#allocation6 + $0x1], 0 }
   0xb   :  { %16 = vsyncpa [#allocation9], 0 }
   0xc   :  { %17 = vsyncpa [#allocation4], 0 }
   0xd   :  { %19 = vsyncpa [#allocation4 + $0x1], 0  ;;  %s1392_s18 = smov 0   ;;  %s1394_s19 = smov 0  }
   0xe   :  { %s1396_s20 = smov 0   ;;  %s1398_s21 = smov 0  }
   0xf   :  { %s1400_s22 = smov 0   ;;  %s1402_s23 = smov 0  }
  0x10   :  { %s1404_s24 = smov 0   ;;  %s1406_s25 = smov 0  }
  0x11   :  { %s1408_s26 = smov 0   ;;  %s1410_s27 = smov 0  }
  0x12   :  { %s1412_s28 = smov 0   ;;  %s1414_s29 = smov 0  }
  0x13   :  { %s1416_s30 = smov 0   ;;  %s1418_s6 = smov 0  }
  0x14 LB: > { %2225 = sst [smem:[#allocation16_spill]] %s1299_s18  ;;  %s34_s7 = sadd.s32 1, %s1343_s29  ;;  %s1351_s6 = sphi %s1418_s6, %s25_s6   ;;  %s1347_s30 = sphi %s1416_s30, %s2298_s30   ;;  %s1343_s29 = sphi %s1414_s29, %s2297_s29   ;;  %s1339_s28 = sphi %s1412_s28, %s2296_s28   ;;  %s1335_s27 = sphi %s1410_s27, %s2295_s27   ;;  %s1331_s26 = sphi %s1408_s26, %s2294_s26   ;;  %s1327_s25 = sphi %s1406_s25, %s2303_s25   ;;  %s1323_s24 = sphi %s1404_s24, %s2302_s24   ;;  %s1319_s23 = sphi %s1402_s23, %s2292_s23   ;;  %s1315_s22 = sphi %s1400_s22, %s2301_s22   ;;  %s1311_s21 = sphi %s1398_s21, %s2300_s21   ;;  %s1307_s20 = sphi %s1396_s20, %s2299_s20   ;;  %s1303_s19 = sphi %s1394_s19, %s2290_s19   ;;  %s1299_s18 = sphi %s1392_s18, %s2289_s18  }
  0x15   : > { %2226 = sst [smem:[#allocation17_spill]] %s1303_s19  ;;  %s37_s8 = sadd.s32 1, %s1347_s30 }
  0x16   : > { %2227 = sst [smem:[#allocation18_spill]] %s1307_s20  ;;  %p35_p0 = scmp.ge.s32.totalorder %s34_s7, 4 }
  0x17   : > { %2228 = sst [smem:[#allocation19_spill]] %s1319_s23  ;;  %p2204_p1 = scmp.eq.s32.totalorder %s1351_s6, 0 }
  0x18   : > { %2229 = sst [smem:[#allocation20_spill]] %s1331_s26  ;;  %s882_s9 = sshll.u32 %s1343_s29, 2 }
  0x19   : > { %2230 = sst [smem:[#allocation21_spill]] %s1335_s27  ;;  %s82_s10 = sadd.s32 1, %s1319_s23 }
  0x1a   : > { %2231 = sst [smem:[#allocation22_spill]] %s1339_s28  ;;  %s2305_s7 = smov (%p35_p0, %s34_s7), 0 }
  0x1b   : > { %2232 = sst [smem:[#allocation23_spill]] %s1343_s29  ;;  %s2307_s8 = smov (!%p35_p0, %s37_s8), %s1347_s30 }
  0x1c   : > { %2233 = sst [smem:[#allocation24_spill]] %s1347_s30  ;;  %s42_s11 = ssub.s32 %s1343_s29, %s2305_s7 }
  0x1d   : > { %2234 = sst [smem:[#allocation25_spill]] %s2305_s7  ;;  %s883_s12 = sadd.s32 4294967295, %s882_s9 }
  0x1e   : > { %p39_p2 = scmp.ge.s32.totalorder %s2307_s8, 2  ;;  %p71_p3 = scmp.gt.s32.totalorder %s883_s12, 0 }
  0x1f   : > { %s884_s13 = sshll.u32 %s2305_s7, 2  ;;  %p89_p4 = scmp.ne.s32.totalorder %s1319_s23, %s1315_s22 }
  0x20   : > { %s2309_s8 = smov (%p39_p2, %s2307_s8), 0  ;;  %s2311_s12 = smov (!%p71_p3, %s883_s12), 0 }
  0x21   : > { %2235 = sst [smem:[#allocation26_spill]] %s2309_s8  ;;  %s1479_s14 = ssub.s32 %s1347_s30, %s2309_s8 }
  0x22   : > { %2236 = sst [smem:[#allocation27_spill]] %s1479_s14  ;;  %s885_s15 = sadd.s32 4294967295, %s884_s13 }
  0x23   : > { %s1482_s16 = sor.u32 %s42_s11, %s1479_s14  ;;  %p75_p5 = scmp.gt.s32.totalorder %s885_s15, 0 }
  0x24   : > { %p1487_p7 = por %p89_p4, %p2204_p1  ;;  %p95_p8 = scmp.ne.s32.totalorder %s1315_s22, %s1311_s21 }
  0x25   : > { %s2313_s15 = smov (!%p75_p5, %s885_s15), 0  ;;  %s1493_s8 = sadd.s32 4, %s882_s9 }
  0x26   : > { %2238 = sst [smem:[#allocation28_spill]] %s1493_s8  ;;  %s78_s7 = ssub.s32 %s2311_s12, %s2313_s15 }
  0x27   : > { %s79_s5 = sor.u32 %s78_s7, %s1479_s14  ;;  %s1497_s11 = sadd.s32 4, %s884_s13 }
  0x28   : > { %p80_p10 = scmp.eq.s32.totalorder %s79_s5, 0  ;;  %p2203_p12 = scmp.lt.s32.totalorder %s1351_s6, 8 }
  0x29   : > { %s1505_s4 = sshll.u32 %s1347_s30, 5  ;;  %s265_s27 = sand.u32 1, %s1351_s6  }
  0x2a   : > { %s1501_s28 = scalar_select %p80_p10, %s1319_s23, %s82_s10  }
  0x2b   : > { %s267_s9 = sand.u32 1, %s1319_s23   ;;  %s899_s18 = sshll.u32 %s2311_s12, 1 }
  0x2c   : > { %2239 = sst [smem:[#allocation29_spill]] %s1501_s28  ;;  %s896_s2 = sshll.u32 %s267_s9, 4 }
  0x2d   : > { %s279_s15 = sadd.s32 %s899_s18, %s1505_s4  ;;  %s269_s7 = scalar_lea.vmem [#allocation5], %s896_s2 }
  0x2e   : > { %s901_s19 = sshll.u32 %s279_s15, 7  ;;  %s282_s13 = sshll.u32 %s269_s7, 4  ;;  %s1515_s13 = int_to_ptr.vmem [resolvable:$true] %s282_s13 }
  0x2f   : > { %s2240_s1 = sld [smem:[#allocation33_spill]]  ;;  %p1521_p13 = pnand %p2203_p12, %p1487_p7 }
  0x30   : > { %s1525_s2 = scalar_lea.sflag [#allocation6], %s265_s27 }
  0x31   : > { %p1077_p2 = pneg %p1521_p13 }
  0x35   : > { %s1513_s20 = scalar_lea.hbm %s2240_s1, %s901_s19  ;;  %s1080_s10 = scalar_lea.hbm %s2240_s1, 8192 }
  0x36   : > { %s1075_s18 = scalar_lea.hbm %s1513_s20, 256  ;;  %p1081_p5 = scmp.lt.u32.totalorder %s1513_s20, %s2240_s1 }
  0x37   : > { %p1076_p0 = scmp.ne.s32.totalorder %s1513_s20, %s1075_s18  ;;  %p1082_p7 = scmp.lt.u32.totalorder %s1080_s10, %s1075_s18 }
  0x38   : > { %p1084_p11 = scmp.lt.u32.totalorder %s1075_s18, %s1513_s20 }
  0x39   : > { %p1078_p3 = pnand %p1077_p2, %p1076_p0  ;;  %p1083_p10 = por %p1082_p7, %p1081_p5 }
  0x3b   : > { %p1079_p4 = pneg %p1078_p3  ;;  %p1085_p9 = por %p1084_p11, %p1083_p10 }
  0x3d   : > { %p1086_p12 = pnand %p1085_p9, %p1079_p4 }
  0x3f   : > { %1089 = shalt.err (!%p1086_p12)
}
  0x40   : > { %s1090_s27 = scalar_lea.vmem %s1515_s13, 256  ;;  %s1353_s17 = smov [#allocation5]  }
  0x41   : > { %p1091_p0 = scmp.ne.s32.totalorder %s1515_s13, %s1090_s27  ;;  %s1095_s9 = sshll.u32 %s1353_s17, 4  ;;  %s1096_s9 = int_to_ptr.vmem [resolvable:$false] %s1095_s9 }
  0x42   : > { %s1097_s15 = scalar_lea.vmem %s1096_s9, 512  ;;  %p1098_p6 = scmp.lt.s32.totalorder %s1515_s13, %s1096_s9 }
  0x43   : > { %p1093_p3 = pnand %p1091_p0, %p1077_p2  ;;  %p1099_p5 = scmp.lt.s32.totalorder %s1097_s15, %s1090_s27 }
  0x45   : > { %p1094_p1 = pneg %p1093_p3  ;;  %p1100_p7 = por %p1099_p5, %p1098_p6 }
  0x47   : > { %p1101_p11 = pnand %p1100_p7, %p1094_p1 }
  0x49   : > { %1104 = shalt.err (!%p1101_p11)
}
  0x4a   : > { %s2205_s7 = smov 128   ;;  %s2207_s18 = smov 8  }
  0x4b   : > { %946 = dma.hbm_to_vmem [thread:$0]  (!%p1521_p13), %s1513_s20, 256, %s1515_s13, %s1525_s2, %s2205_s7, %s2205_s7, %s2207_s18  }
  0x4c   : > { %s1557_s19 = sadd.s32 4294967295, %s1351_s6   ;;  %p888_p1 = scmp.ge.s32.totalorder %s1351_s6, 1 }
  0x4d   : > { %p2209_p6 = scmp.eq.s32.totalorder %s1557_s19, 0  ;;  %p212_p12 = scmp.lt.s32.totalorder %s1351_s6, 9 }
  0x4e   : > { %s1356_s20 = smov [#allocation8]   ;;  %s881_s21 = sadd.s32 4294967294, %s1351_s6  }
  0x4f   : > { %p1568_p2 = por %p95_p8, %p2209_p6  ;;  %p1572_p4 = pnand %p888_p1, %p212_p12 }
  0x50   : > { %s224_s13 = sshll.u32 %s1356_s20, 4  ;;  %s46_s12 = sadd.s32 1, %s1331_s26  ;;  %s225_s13 = int_to_ptr.vmem [resolvable:$true] %s224_s13 }
  0x51   : > { %s2242_s8 = scalar_select %p1568_p2, 1, 0 }
  0x52   : > { %s2243_s5 = scalar_select %p1572_p4, 1, 0 }
  0x53   : > { %p936_p13 = pneg %p1572_p4  ;;  %s2245_s3 = sld [smem:[#allocation35_spill]] }
  0x55   : > { %p1580_p10 = pnand %p936_p13, %p2209_p6 }
  0x57   : > { %p1107_p0 = pneg %p1580_p10 }
  0x59   : > { %s1105_s17 = scalar_lea.hbm %s2245_s3, 256 }
  0x5a   : > { %p1106_p8 = scmp.ne.s32.totalorder %s2245_s3, %s1105_s17  ;;  %p1112_p7 = scmp.lt.u32.totalorder %s1105_s17, %s2245_s3 }
  0x5c   : > { %p1108_p3 = pnand %p1107_p0, %p1106_p8 }
  0x5e   : > { %p1109_p5 = pneg %p1108_p3 }
  0x60   : > { %p1114_p11 = pnand %p1112_p7, %p1109_p5 }
  0x62   : > { %1117 = shalt.err (!%p1114_p11)
}
  0x63   : > { %s1118_s18 = scalar_lea.vmem %s225_s13, 256  ;;  %p1126_p9 = scmp.lt.s32.totalorder %s225_s13, %s225_s13 }
  0x64   : > { %p1119_p1 = scmp.ne.s32.totalorder %s225_s13, %s1118_s18  ;;  %p1127_p6 = scmp.lt.s32.totalorder %s1118_s18, %s1118_s18 }
  0x66   : > { %p1121_p12 = pnand %p1119_p1, %p1107_p0  ;;  %p1128_p2 = por %p1127_p6, %p1126_p9 }
  0x68   : > { %p1122_p13 = pneg %p1121_p12 }
  0x6a   : > { %p1129_p4 = pnand %p1128_p2, %p1122_p13 }
  0x6c   : > { %1132 = shalt.err (!%p1129_p4)
}
  0x6d   : > { %s2246_s14 = smov 8   ;;  %s2247_s27 = smov 128  }
  0x6e   : > { %939 = dma.hbm_to_vmem [thread:$0]  (!%p1580_p10), %s2245_s3, 256, %s225_s13, [#allocation9], %s2247_s27, %s2247_s27, %s2246_s14  }
  0x6f   : > { %p2248_p6 = scmp.eq.s32.totalorder %s1482_s16, 0  ;;  %p53_p9 = scmp.ne.s32.totalorder %s1331_s26, %s1327_s25 }
  0x70   : > { %p59_p2 = scmp.ne.s32.totalorder %s1327_s25, %s1323_s24  ;;  %p205_p4 = scmp.eq.s32.totalorder %s881_s21, 7 }
  0x71   : > { %s1608_s7 = scalar_select %p2248_p6, %s1331_s26, %s46_s12  }
  0x72   : > { %s241_s18 = sand.u32 1, %s1331_s26   ;;  %p2250_p8 = scmp.eq.s32.totalorder %s1351_s6, 0 }
  0x73   : > { %2249 = sst [smem:[#allocation30_spill]] %s1608_s7  ;;  %p2251_p3 = scmp.eq.s32.totalorder %s1557_s19, 0 }
  0x74   : > { %p55_p0 = por %p2250_p8, %p53_p9  ;;  %p2253_p7 = scmp.eq.s32.totalorder %s1557_s19, 7 }
  0x75   : > { %p1619_p5 = por %p2251_p3, %p59_p2  ;;  %p1629_p10 = por %p205_p4, %p59_p2 }
  0x76   : > { %p1625_p11 = por %p2253_p7, %p53_p9  ;;  %s891_s13 = sshll.u32 %s241_s18, 6 }
  0x77   : > { %s2255_s16 = scalar_select %p1629_p10, 1, 0 }
  0x78   : > { %s2254_s17 = scalar_select %p1625_p11, 1, 0 }
  0x79   : > { %2256 = sst [smem:[#allocation31_spill]] %s2255_s16  ;;  %s922_s12 = sshll.u32 %s1343_s29, 3 }
  0x7a   : > { %s252_s21 = sadd.s32 %s922_s12, %s1505_s4  ;;  %s245_s20 = scalar_lea.vmem [#allocation2], %s891_s13 }
  0x7b   : > { %s255_s9 = sshll.u32 %s245_s20, 4  ;;  %s895_s15 = sshll.u32 %s252_s21, 7  ;;  %s1635_s9 = int_to_ptr.vmem [resolvable:$true] %s255_s9 }
  0x7c   : > { %s2257_s0 = sld [smem:[#allocation32_spill]]  ;;  %p2258_p1 = scmp.lt.s32.totalorder %s1351_s6, 8 }
  0x7d   : > { %s1648_s13 = scalar_lea.sflag [#allocation3], %s241_s18 }
  0x7e   : > { %p1644_p12 = pnand %p2258_p1, %p55_p0 }
  0x80   : > { %p1135_p6 = pneg %p1644_p12 }
  0x82   : > { %s1640_s30 = scalar_lea.hbm %s2257_s0, %s895_s15  ;;  %s1138_s21 = scalar_lea.hbm %s2257_s0, 8192 }
  0x83   : > { %s1133_s12 = scalar_lea.hbm %s1640_s30, 1024  ;;  %p1139_p4 = scmp.lt.u32.totalorder %s1640_s30, %s2257_s0 }
  0x84   : > { %p1134_p13 = scmp.ne.s32.totalorder %s1640_s30, %s1133_s12  ;;  %p1140_p8 = scmp.lt.u32.totalorder %s1138_s21, %s1133_s12 }
  0x85   : > { %p1142_p3 = scmp.lt.u32.totalorder %s1133_s12, %s1640_s30 }
  0x86   : > { %p1136_p9 = pnand %p1135_p6, %p1134_p13  ;;  %p1141_p0 = por %p1140_p8, %p1139_p4 }
  0x88   : > { %p1137_p2 = pneg %p1136_p9  ;;  %p1143_p7 = por %p1142_p3, %p1141_p0 }
  0x8a   : > { %p1144_p1 = pnand %p1143_p7, %p1137_p2 }
  0x8c   : > { %1147 = shalt.err (!%p1144_p1)
}
  0x8d   : > { %s1148_s18 = scalar_lea.vmem %s1635_s9, 1024  ;;  %s1357_s1 = smov [#allocation2]  }
  0x8e   : > { %p1149_p13 = scmp.ne.s32.totalorder %s1635_s9, %s1148_s18  ;;  %s1153_s3 = sshll.u32 %s1357_s1, 4  ;;  %s1154_s3 = int_to_ptr.vmem [resolvable:$false] %s1153_s3 }
  0x8f   : > { %s1155_s20 = scalar_lea.vmem %s1154_s3, 2048  ;;  %p1156_p11 = scmp.lt.s32.totalorder %s1635_s9, %s1154_s3 }
  0x90   : > { %p1151_p9 = pnand %p1149_p13, %p1135_p6  ;;  %p1157_p4 = scmp.lt.s32.totalorder %s1155_s20, %s1148_s18 }
  0x92   : > { %p1152_p10 = pneg %p1151_p9  ;;  %p1158_p8 = por %p1157_p4, %p1156_p11 }
  0x94   : > { %p1159_p0 = pnand %p1158_p8, %p1152_p10 }
  0x96   : > { %1162 = shalt.err (!%p1159_p0)
}
  0x97   : > { %s2260_s12 = sld [smem:[#allocation18_spill]]  ;;  %s2261_s21 = sld [smem:[#allocation28_spill]] }
  0x98   : > { %s2262_s15 = sld [smem:[#allocation17_spill]]  ;;  %s2263_s1 = sld [smem:[#allocation16_spill]] }
  0x99   : > { %s2264_s18 = sld [smem:[#allocation27_spill]]  ;;  %p2266_p10 = scmp.lt.s32.totalorder %s1497_s11, 15 }
  0x9a   : > { %943 = dma.hbm_to_vmem [thread:$0]  (!%p1644_p12), %s1640_s30, 1024, %s1635_s9, %s1648_s13, %s2247_s27, %s2247_s27, %s2246_s14  }
  0x9b   : > { %s2317_s11 = smov (!%p2266_p10, %s1497_s11), 15  ;;  %p2267_p3 = scmp.eq.s32.totalorder %s1351_s6, 0 }
  0x9c   : > { %p2268_p13 = scmp.eq.s32.totalorder %s1557_s19, 0  ;;  %s2270_s23 = sld [smem:[#allocation34_spill]] }
  0x9d   : > { %s118_s7 = sadd.s32 1, %s2260_s12  ;;  %p2265_p11 = scmp.lt.s32.totalorder %s2261_s21, 15 }
  0x9e   : > { %p125_p6 = scmp.ne.s32.totalorder %s2260_s12, %s2262_s15  ;;  %p131_p2 = scmp.ne.s32.totalorder %s2262_s15, %s2263_s1 }
  0x9f   : > { %s2315_s21 = smov (!%p2265_p11, %s2261_s21), 15  ;;  %s294_s20 = sand.u32 1, %s2260_s12  }
  0xa0   : > { %s114_s3 = ssub.s32 %s2315_s21, %s2317_s11  ;;  %p127_p7 = por %p125_p6, %p2267_p3 }
  0xa1   : > { %s115_s0 = sor.u32 %s114_s3, %s2264_s18  ;;  %p1696_p9 = por %p131_p2, %p2268_p13 }
  0xa2   : > { %p116_p1 = scmp.eq.s32.totalorder %s115_s0, 0  ;;  %s902_s30 = sshll.u32 %s294_s20, 4 }
  0xa3   : > { %s2269_s29 = scalar_select %p1696_p9, 1, 0 }
  0xa4   : > { %s904_s9 = sshll.u32 %s2315_s21, 1  ;;  %s2319_s12 = smov (!%p116_p1, %s2260_s12), %s118_s7 }
  0xa5   : > { %s306_s13 = sadd.s32 %s904_s9, %s1505_s4  ;;  %s296_s28 = scalar_lea.vmem [#allocation7], %s902_s30 }
  0xa6   : > { %s906_s26 = sshll.u32 %s306_s13, 7  ;;  %s309_s15 = sshll.u32 %s296_s28, 4  ;;  %s1709_s15 = int_to_ptr.vmem [resolvable:$true] %s309_s15 }
  0xa7   : > { %s2271_s16 = smov %s2270_s23  ;;  %s1707_s18 = scalar_lea.hbm %s2270_s23, %s906_s26 }
  0xa8   : > { %p2272_p12 = scmp.lt.s32.totalorder %s1351_s6, 8  ;;  %s1163_s4 = scalar_lea.hbm %s1707_s18, 256 }
  0xa9   : > { %p1164_p8 = scmp.ne.s32.totalorder %s1707_s18, %s1163_s4  ;;  %s1168_s28 = scalar_lea.hbm %s2271_s16, 8192 }
  0xaa   : > { %p1713_p4 = pnand %p2272_p12, %p127_p7  ;;  %p1169_p6 = scmp.lt.u32.totalorder %s1707_s18, %s2271_s16 }
  0xab   : > { %p1170_p2 = scmp.lt.u32.totalorder %s1168_s28, %s1163_s4  ;;  %p1172_p7 = scmp.lt.u32.totalorder %s1163_s4, %s1707_s18 }
  0xac   : > { %p1165_p0 = pneg %p1713_p4 }
  0xad   : > { %p1171_p3 = por %p1170_p2, %p1169_p6 }
  0xae   : > { %p1166_p11 = pnand %p1165_p0, %p1164_p8 }
  0xaf   : > { %p1173_p1 = por %p1172_p7, %p1171_p3 }
  0xb0   : > { %p1167_p10 = pneg %p1166_p11 }
  0xb2   : > { %p1174_p13 = pnand %p1173_p1, %p1167_p10 }
  0xb4   : > { %1177 = shalt.err (!%p1174_p13)
}
  0xb5   : > { %s1178_s3 = scalar_lea.vmem %s1709_s15, 256  ;;  %s1358_s20 = smov [#allocation7]  }
  0xb6   : > { %p1179_p12 = scmp.ne.s32.totalorder %s1709_s15, %s1178_s3  ;;  %s1183_s30 = sshll.u32 %s1358_s20, 4  ;;  %s1184_s30 = int_to_ptr.vmem [resolvable:$false] %s1183_s30 }
  0xb7   : > { %s1185_s9 = scalar_lea.vmem %s1184_s30, 512  ;;  %p1186_p9 = scmp.lt.s32.totalorder %s1709_s15, %s1184_s30 }
  0xb8   : > { %p1181_p8 = pnand %p1179_p12, %p1165_p0  ;;  %p1187_p6 = scmp.lt.s32.totalorder %s1185_s9, %s1178_s3 }
  0xba   : > { %p1182_p11 = pneg %p1181_p8  ;;  %p1188_p2 = por %p1187_p6, %p1186_p9 }
  0xbc   : > { %p1189_p3 = pnand %p1188_p2, %p1182_p11 }
  0xbe   : > { %1192 = shalt.err (!%p1189_p3)
}
  0xbf   : > { %949 = dma.hbm_to_vmem [thread:$0]  (!%p1713_p4), %s1707_s18, 256, %s1709_s15, %s1525_s2, %s2247_s27, %s2247_s27, %s2246_s14  }
  0xc0   : > { %p2274_p0 = scmp.ne.s32.totalorder %s2243_s5, 0 }
  0xc1   : > { %s1749_s13 = sand.u32 (!%p2274_p0), 1, %s1327_s25  }
  0xc2   : > { %321 = sbr.rel (%p2274_p0) target bundleno = 305 (0x131), region = 40  ;;  %s908_s1 = sshll.u32 (!%p2274_p0), %s1749_s13, 6 }
  0xc3   : > { %s324_s11 = scalar_lea.sflag (!%p2274_p0), [#allocation3], %s1749_s13  ;;  %s1755_s0 = scalar_lea.vmem (!%p2274_p0), [#allocation2], %s908_s1 }
  0xc9   : > { %1278 = dma.done.wait (%p1619_p5), %s324_s11, 1024  }
  0xca   : > { %1280 = vsyncadd (%p1619_p5), %s324_s11, 4294966272  ;;  %s332_s2 = sand.u32 1, %s1557_s19   ;;  %s334_s5 = sand.u32 1, %s1315_s22  }
  0xcb   : > { %s1763_s14 = sshll.u32 %s334_s5, 4  ;;  %s333_s27 = scalar_lea.sflag [#allocation6], %s332_s2 }
  0xcc   : > { %s336_s15 = scalar_lea.vmem [#allocation5], %s1763_s14  ;;  %p2275_p9 = scmp.ne.s32.totalorder %s2242_s8, 0 }
  0xce   : > { %1282 = dma.done.wait (%p2275_p9), %s333_s27, 256  }
  0xcf   : > { %1284 = vsyncadd (%p2275_p9), %s333_s27, 4294967040  ;;  %s2276_s18 = sld [smem:[#allocation17_spill]]  ;;  %p2277_p5 = scmp.ne.s32.totalorder %s2269_s29, 0 }
  0xd5   : > { %s343_s4 = sand.u32 1, %s2276_s18  }
  0xd6   : > { %s1771_s10 = sshll.u32 %s343_s4, 4 }
  0xd7   : > { %s345_s23 = scalar_lea.vmem [#allocation7], %s1771_s10 }
  0xd8   : > { %1286 = dma.done.wait (%p2277_p5), %s333_s27, 256  }
  0xd9   : > { %1288 = vsyncadd (%p2277_p5), %s333_s27, 4294967040  ;;  %p2278_p4 = scmp.eq.s32.totalorder %s1557_s19, 0 }
  0xdb   : > { %1290 = dma.done.wait (%p2278_p4), [#allocation9], 256   ;;  %p2279_p10 = pmov %p2278_p4 }
  0xdc   : > { %s2280_s8 = sld [smem:[#allocation21_spill]]  ;;  %v422_v0 = vlaneseq  ;;  %v1790_v6 = vld [vmem:[%s1755_s0] sm:$0xff]  ;;  %v1793_v7 = vld [vmem:[%s1755_s0 + $0x8] sm:$0xff]  ;;  %v1796_v8 = vld [vmem:[%s1755_s0 + $0x10] sm:$0xff]  ;;  %s2281_s21 = sld [smem:[#allocation36_spill]] }
  0xdd   : > { %1292 = vsyncadd (%p2279_p10), [#allocation9], 4294967040  ;;  %v1802_v11 = vld [vmem:[%s1755_s0 + $0x18] sm:$0xff]  ;;  %v404_v12 = vld [vmem:[%s336_s15] sm:$0xff]  ;;  %v426_v14 = vrot.slane %v1790_v6, 7  ;;  %v427_v15 = vrot.slane %v1796_v8, 7 }
  0xde   : > { %v1783_v1 = vshrl.u32 %v422_v0, 7  ;;  %v405_v13 = vld [vmem:[%s336_s15 + $0x8] sm:$0xff]  ;;  %v432_v16 = vrot.slane %v1793_v7, 7  ;;  %v420_v19 = vld [vmem:[#allocation8] sm:$0xff]  ;;  %v433_v20 = vrot.slane %v1802_v11, 7  ;;  %v589_v30 = vrot.slane %v1790_v6, 1 }
  0xdf   : > { %v590_v43 = vrot.slane %v1796_v8, 1  ;;  %v595_v45 = vrot.slane %v1793_v7, 1  ;;  %v596_v46 = vrot.slane %v1802_v11, 1  ;;  %v1871_v61 = vld [vmem:[%s1755_s0 + $0x20] sm:$0xff]  ;;  %v1874_v62 = vld [vmem:[%s1755_s0 + $0x28] sm:$0xff]  ;;  %s1968_s7 = scalar_lea.vmem [#allocation10], %s908_s1 }
  0xe0   : > { %vm437_vm0 = vcmp.lt.s32.totalorder %v1783_v1, 1  ;;  %v470_v3 = vsub.s32 0, %v1783_v1  ;;  %v490_v4 = vsub.s32 3, %v1783_v1  ;;  %v510_v5 = vsub.s32 6, %v1783_v1  ;;  %s2282_s30 = sld [smem:[#allocation22_spill]]  ;;  %s2283_s27 = sld [smem:[#allocation37_spill]] }
  0xe1   : > { %vm450_vm1 = vcmp.ge.s32.totalorder %v1783_v1, 1  ;;  %v530_v9 = vsub.s32 1, %v1783_v1  ;;  %v550_v10 = vsub.s32 4, %v1783_v1  ;;  %v570_v21 = vsub.s32 7, %v1783_v1  ;;  %s715_s4 = scalar_lea.sflag [#allocation4], %s1749_s13  ;;  %p2285_p12 = scmp.ne.s32.totalorder %s2254_s17, 0 }
  0xe2   : > { %p406_p7 = scmp.gt.s32.totalorder %s2280_s8, 0  ;;  %v445_v22 = vsel %vm437_vm0, %v432_v16, %v426_v14  ;;  %v1811_v23 = vrot.slane %v420_v19, %v470_v3  ;;  %v1813_v24 = vrot.slane %v420_v19, %v490_v4  ;;  %v1815_v25 = vrot.slane %v420_v19, %v510_v5  ;;  %v1885_v4 = vld [vmem:[#allocation8 + $0x8] ss:$0 sm:$0xff]  ;;  %p414_p1 = scmp.lt.s32.totalorder %s2280_s8, 3 }
  0xe3   : > { %v446_v28 = vsel %vm437_vm0, %v433_v20, %v427_v15  ;;  %v458_v29 = vsel %vm450_vm1, %v445_v22, 0.0  ;;  %vm600_vm2 = vcmp.lt.s32.totalorder %v1783_v1, 7  ;;  %v633_v31 = vsub.s32 2, %v1783_v1  ;;  %s923_s9 = sshll.u32 %s2280_s8, 3 }
  0xe4   : > { %s407_s26 = scalar_select %p406_p7, 1, 0  ;;  %v653_v32 = vsub.s32 5, %v1783_v1  ;;  %v492_v34 = vmul.f32 %v1813_v24, %v458_v29  ;;  %v1828_v35 = vrot.slane %v420_v19, %v530_v9  ;;  %v1834_v38 = vsel %vm450_vm1, %v446_v28, 0.0 }
  0xe5   : > { %v1836_v39 = vrot.slane %v420_v19, %v550_v10  ;;  %v1838_v40 = vrot.slane %v420_v19, %v570_v21  ;;  %v512_v42 = vmul.f32 %v1815_v25, %v1834_v38  ;;  %v1846_v47 = vrot.slane %v420_v19, %v633_v31  ;;  %s1995_s3 = scalar_select %p414_p1, 1, 0 }
  0xe6   : > { %s408_s28 = scvt.s32.f32 %s407_s26  ;;  %v439_v52 = vsel %vm437_vm0, %v426_v14, %v432_v16  ;;  %v1859_v55 = vrot.slane %v420_v19, %v653_v32  ;;  %v1862_v56 = vadd.s32 8, %v1783_v1  ;;  %v1866_v58 = vsel %vm437_vm0, %v427_v15, %v433_v20  ;;  %s918_s1 = sshll.u32 %s2282_s30, 5 }
  0xe7   : > { %v552_v53 = vmul.f32 %v1836_v39, %v1790_v6  ;;  %v572_v54 = vmul.f32 %v1838_v40, %v1796_v8  ;;  %v493_v60 = vmul.f32 %v1813_v24, %v439_v52  ;;  %v602_v63 = vsel %vm600_vm2, %v589_v30, %v595_v45  ;;  %s416_s20 = scvt.s32.f32 %s1995_s3  ;;  %s728_s11 = sadd.s32 %s923_s9, %s918_s1 }
  0xe8   : > { %v409_v2 = vstv %s408_s28  ;;  %v1880_v0 = vsel %vm600_vm2, %v590_v43, %v596_v46  ;;  %v513_v3 = vmul.f32 %v1815_v25, %v1866_v58  ;;  %vm614_vm3 = vcmp.lt.s32.totalorder %v1862_v56, 15  ;;  %s919_s2 = sshll.u32 %s728_s11, 7  ;;  %s2284_s15 = smov %s2283_s27 }
  0xe9   : > { %v410_v17 = vmul.f32 %v409_v2, %v404_v12  ;;  %v411_v18 = vmul.f32 %v409_v2, %v405_v13  ;;  %v655_v13 = vmul.f32 %v1859_v55, %v602_v63  ;;  %v428_v14 = vrot.slane %v1871_v61, 7  ;;  %s2108_s18 = scalar_lea.hbm %s2283_s27, %s919_s2 }
  0xea   : > { %v434_v15 = vrot.slane %v1874_v62, 7  ;;  %v553_v19 = vmul.f32 %v1836_v39, %v1793_v7  ;;  %v608_v20 = vsel %vm600_vm2, %v595_v45, %v589_v30  ;;  %v609_v21 = vsel %vm600_vm2, %v596_v46, %v590_v43 }
  0xeb   : > { %v425_v26 = vrot.slane %v410_v17, 7  ;;  %v431_v27 = vrot.slane %v411_v18, 7  ;;  %v588_v36 = vrot.slane %v410_v17, 1  ;;  %v594_v44 = vrot.slane %v411_v18, 1 }
  0xec   : > { %v532_v50 = vmul.f32 %v1828_v35, %v410_v17  ;;  %v533_v10 = vmul.f32 %v1828_v35, %v411_v18  ;;  %v675_v18 = vmul.f32 %v1885_v4, %v1880_v0  ;;  %v573_v31 = vmul.f32 %v1838_v40, %v1802_v11 }
  0xed   : > { %v444_v33 = vsel %vm437_vm0, %v431_v27, %v425_v26  ;;  %v438_v48 = vsel %vm437_vm0, %v425_v26, %v431_v27  ;;  %v601_v51 = vsel %vm600_vm2, %v588_v36, %v594_v44  ;;  %v607_v12 = vsel %vm600_vm2, %v594_v44, %v588_v36 }
  0xee   : > { %v456_v37 = vsel %vm450_vm1, %v444_v33, 0.0  ;;  %v473_v59 = vmul.f32 %v1811_v23, %v438_v48  ;;  %v635_v2 = vmul.f32 %v1846_v47, %v601_v51  ;;  %v620_v22 = vsel %vm614_vm3, %v607_v12, 0.0 }
  0xef   : > { %v472_v41 = vmul.f32 %v1811_v23, %v456_v37  ;;  %v447_v26 = vsel %vm437_vm0, %v434_v15, %v428_v14  ;;  %v622_v32 = vsel %vm614_vm3, %v608_v20, 0.0  ;;  %v474_v33 = vmul.f32 %v1811_v23, %v458_v29 }
  0xf0   : > { %v501_v9 = vadd.f32 %v493_v60, %v473_v59  ;;  %v1910_v30 = vsel %vm450_vm1, %v447_v26, 0.0  ;;  %v636_v43 = vmul.f32 %v1846_v47, %v620_v22  ;;  %v656_v44 = vmul.f32 %v1859_v55, %v622_v32 }
  0xf1   : > { %v500_v49 = vadd.f32 %v492_v34, %v472_v41  ;;  %v494_v34 = vmul.f32 %v1813_v24, %v1834_v38  ;;  %v514_v36 = vmul.f32 %v1815_v25, %v1910_v30  ;;  %v534_v29 = vmul.f32 %v1828_v35, %v1790_v6 }
  0xf2   : > { %v521_v17 = vadd.f32 %v513_v3, %v501_v9  ;;  %v554_v46 = vmul.f32 %v1836_v39, %v1796_v8  ;;  %v597_v51 = vrot.slane %v1874_v62, 1  ;;  %v475_v6 = vmul.f32 %v1811_v23, %v439_v52 }
  0xf3   : > { %v520_v57 = vadd.f32 %v512_v42, %v500_v49  ;;  %v1921_v42 = vsel %vm614_vm3, %v609_v21, 0.0  ;;  %v502_v45 = vadd.f32 %v494_v34, %v474_v33  ;;  %v495_v59 = vmul.f32 %v1813_v24, %v1866_v58 }
  0xf4   : > { %v541_v28 = vadd.f32 %v533_v10, %v521_v17  ;;  %v676_v3 = vmul.f32 %v1885_v4, %v1921_v42  ;;  %v574_v10 = vmul.f32 %v1838_v40, %v1871_v61  ;;  %v535_v52 = vmul.f32 %v1828_v35, %v1793_v7 }
  0xf5   : > { %v540_v5 = vadd.f32 %v532_v50, %v520_v57  ;;  %v591_v50 = vrot.slane %v1871_v61, 1  ;;  %v1938_v57 = vsel %vm437_vm0, %v428_v14, %v434_v15  ;;  %v503_v12 = vadd.f32 %v495_v59, %v475_v6 }
  0xf6   : > { %v561_v41 = vadd.f32 %v553_v19, %v541_v28  ;;  %v657_v17 = vmul.f32 %v1859_v55, %v1880_v0  ;;  %v1959_v19 = vld [vmem:[%s1755_s0 + $0x38] sm:$0xff]  ;;  %v555_v21 = vmul.f32 %v1836_v39, %v1802_v11  ;;  %v575_v26 = vmul.f32 %v1838_v40, %v1874_v62 }
  0xf7   : > { %v560_v16 = vadd.f32 %v552_v53, %v540_v5  ;;  %v1934_v53 = vld [vmem:[%s2281_s21] ss:$0 sm:$0xff]  ;;  %v515_v5 = vmul.f32 %v1815_v25, %v1938_v57  ;;  %v610_v7 = vsel %vm600_vm2, %v597_v51, %v591_v50  ;;  %v1973_v22 = vsel %vm600_vm2, %v591_v50, %v597_v51 }
  0xf8   : > { %v581_v49 = vadd.f32 %v573_v31, %v561_v41  ;;  %v435_v33 = vrot.slane %v1959_v19, 7  ;;  %v476_v34 = vmul.f32 %v1811_v23, %v1834_v38  ;;  %v1986_v41 = vsel %vm614_vm3, %v610_v7, 0.0 }
  0xf9   : > { %v580_v27 = vadd.f32 %v572_v54, %v560_v16  ;;  %v522_v54 = vadd.f32 %v514_v36, %v502_v45  ;;  %v637_v16 = vmul.f32 %v1846_v47, %v602_v63  ;;  %v658_v38 = vmul.f32 %v1859_v55, %v1921_v42 }
  0xfa   : > { %v536_v6 = vmul.f32 %v1828_v35, %v1796_v8  ;;  %v556_v59 = vmul.f32 %v1836_v39, %v1871_v61  ;;  %v659_v7 = vmul.f32 %v1859_v55, %v1973_v22 }
  0xfb   : > { %v643_v37 = vadd.f32 %v635_v2, %v580_v27  ;;  %v644_v2 = vadd.f32 %v636_v43, %v581_v49  ;;  %v542_v9 = vadd.f32 %v534_v29, %v522_v54  ;;  %v496_v43 = vmul.f32 %v1813_v24, %v1910_v30 }
  0xfc   : > { %v638_v29 = vmul.f32 %v1846_v47, %v622_v32 }
  0xfd   : > { %v663_v48 = vadd.f32 %v655_v13, %v643_v37  ;;  %v1952_v13 = vld [vmem:[%s1755_s0 + $0x30] sm:$0xff]  ;;  %v664_v15 = vadd.f32 %v656_v44, %v644_v2  ;;  %v562_v20 = vadd.f32 %v554_v46, %v542_v9  ;;  %v677_v37 = vmul.f32 %v1885_v4, %v1973_v22  ;;  %s731_s0 = sshll.u32 %s1968_s7, 4  ;;  %s2101_s0 = int_to_ptr.vmem [resolvable:$true] %s731_s0 }
  0xfe   : > { %v429_v27 = vrot.slane %v1952_v13, 7  ;;  %v504_v50 = vadd.f32 %v496_v43, %v476_v34  ;;  %v598_v2 = vrot.slane %v1959_v19, 1  ;;  %v576_v8 = vmul.f32 %v1838_v40, %v1952_v13  ;;  %s1193_s10 = scalar_lea.vmem %s2101_s0, 1024 }
  0xff   : > { %v683_v60 = vadd.f32 %v675_v18, %v663_v48  ;;  %v523_v18 = vadd.f32 %v515_v5, %v503_v12  ;;  %v684_v63 = vadd.f32 %v676_v3, %v664_v15  ;;  %v582_v28 = vadd.f32 %v574_v10, %v562_v20  ;;  %v412_v20 = vld [vmem:[%s345_s23] sm:$0xff]  ;;  %p1194_p13 = scmp.ne.s32.totalorder %s2101_s0, %s1193_s10 }
 0x100   : > { %v448_v46 = vsel %vm437_vm0, %v435_v33, %v429_v27  ;;  %v678_v48 = vmul.f32 %v1885_v4, %v1986_v41  ;;  %v477_v3 = vmul.f32 %v1811_v23, %v1866_v58  ;;  %v442_v12 = vsel %vm437_vm0, %v429_v27, %v435_v33 }
 0x101   : > { %v698_v14 = vadd.f32 %v1934_v53, %v683_v60  ;;  %v543_v31 = vadd.f32 %v535_v52, %v523_v18  ;;  %v699_v36 = vadd.f32 %v1934_v53, %v684_v63  ;;  %v645_v44 = vadd.f32 %v637_v16, %v582_v28  ;;  %v413_v18 = vld [vmem:[%s345_s23 + $0x8] sm:$0xff]  ;;  %p1195_p8 = pnand %p1194_p13, %p2285_p12  ;;  %s1359_s23 = smov [#allocation10]  }
 0x102   : > { %v464_v49 = vsel %vm450_vm1, %v448_v46, 0.0  ;;  %v592_v60 = vrot.slane %v1952_v13, 1  ;;  %v497_v52 = vmul.f32 %v1813_v24, %v1938_v57  ;;  %v577_v46 = vmul.f32 %v1838_v40, %v1959_v19  ;;  %s1197_s8 = sshll.u32 %s1359_s23, 4  ;;  %s1198_s8 = int_to_ptr.vmem [resolvable:$false] %s1197_s8 }
 0x103   : > { %706 = vst [vmem:[%s1968_s7] sm:$0xff] %v698_v14  ;;  %v563_v45 = vadd.f32 %v555_v21, %v543_v31  ;;  %707 = vst [vmem:[%s1968_s7 + $0x8] sm:$0xff] %v699_v36  ;;  %v665_v51 = vadd.f32 %v657_v17, %v645_v44  ;;  %v516_v54 = vmul.f32 %v1815_v25, %v464_v49  ;;  %v417_v31 = vstv %s416_s20  ;;  %p1196_p11 = pneg %p1195_p8  ;;  %s1199_s26 = scalar_lea.vmem %s1198_s8, 2048 }
 0x104   : > { %v517_v14 = vmul.f32 %v1815_v25, %v442_v12  ;;  %v639_v17 = vmul.f32 %v1846_v47, %v1880_v0  ;;  %v2030_v21 = vsel %vm600_vm2, %v592_v60, %v598_v2  ;;  %v505_v63 = vadd.f32 %v497_v52, %v477_v3  ;;  %p1200_p6 = scmp.lt.s32.totalorder %s2101_s0, %s1198_s8  ;;  %p1201_p2 = scmp.lt.s32.totalorder %s1199_s26, %s1193_s10 }
 0x105   : > { %v583_v32 = vadd.f32 %v575_v26, %v563_v45  ;;  %v685_v5 = vadd.f32 %v677_v37, %v665_v51  ;;  %v524_v10 = vadd.f32 %v516_v54, %v504_v50  ;;  %v537_v26 = vmul.f32 %v1828_v35, %v1802_v11 }
 0x106   : > { %v557_v0 = vmul.f32 %v1836_v39, %v1874_v62  ;;  %v525_v33 = vadd.f32 %v517_v14, %v505_v63  ;;  %v611_v34 = vsel %vm600_vm2, %v598_v2, %v592_v60  ;;  %v418_v36 = vmul.f32 %v417_v31, %v412_v20  ;;  %p1202_p3 = por %p1201_p2, %p1200_p6 }
 0x107   : > { %v646_v9 = vadd.f32 %v638_v29, %v583_v32  ;;  %v700_v15 = vadd.f32 %v1934_v53, %v685_v5  ;;  %v544_v58 = vadd.f32 %v536_v6, %v524_v10  ;;  %v419_v37 = vmul.f32 %v417_v31, %v413_v18 }
 0x108   : > { %v478_v11 = vmul.f32 %v1811_v23, %v1910_v30  ;;  %v498_v45 = vmul.f32 %v1813_v24, %v464_v49  ;;  %v545_v29 = vadd.f32 %v537_v26, %v525_v33  ;;  %v679_v51 = vmul.f32 %v1885_v4, %v2030_v21  ;;  %p1203_p0 = pnand %p1202_p3, %p1196_p11 }
 0x109   : > { %v666_v16 = vadd.f32 %v658_v38, %v646_v9  ;;  %708 = vst [vmem:[%s1968_s7 + $0x10] sm:$0xff] %v700_v15  ;;  %v564_v28 = vadd.f32 %v556_v59, %v544_v58  ;;  %v430_v38 = vrot.slane %v418_v36, 7  ;;  %v640_v32 = vmul.f32 %v1846_v47, %v1921_v42 }
 0x10a   : > { %v565_v54 = vadd.f32 %v557_v0, %v545_v29  ;;  %v628_v30 = vsel %vm614_vm3, %v611_v34, 0.0  ;;  %v506_v6 = vadd.f32 %v498_v45, %v478_v11  ;;  %v660_v60 = vmul.f32 %v1859_v55, %v1986_v41 }
 0x10b   : > { %v686_v27 = vadd.f32 %v678_v48, %v666_v16  ;;  %v584_v44 = vadd.f32 %v576_v8, %v564_v28  ;;  %v436_v48 = vrot.slane %v419_v37, 7  ;;  %v680_v2 = vmul.f32 %v1885_v4, %v628_v30 }
 0x10c   : > { %v585_v5 = vadd.f32 %v577_v46, %v565_v54  ;;  %v538_v9 = vmul.f32 %v1828_v35, %v1871_v61  ;;  %v558_v52 = vmul.f32 %v1836_v39, %v1952_v13  ;;  %v479_v14 = vmul.f32 %v1811_v23, %v1938_v57 }
 0x10d   : > { %v701_v43 = vadd.f32 %v1934_v53, %v686_v27  ;;  %v647_v50 = vadd.f32 %v639_v17, %v584_v44  ;;  %v449_v49 = vsel %vm437_vm0, %v436_v48, %v430_v38  ;;  %v443_v10 = vsel %vm437_vm0, %v430_v38, %v436_v48 }
 0x10e   : > { %v466_v3 = vsel %vm450_vm1, %v449_v49, 0.0  ;;  %v499_v15 = vmul.f32 %v1813_v24, %v442_v12  ;;  %v648_v16 = vadd.f32 %v640_v32, %v585_v5  ;;  %v593_v17 = vrot.slane %v418_v36, 1 }
 0x10f   : > { %709 = vst [vmem:[%s1968_s7 + $0x18] sm:$0xff] %v701_v43  ;;  %v667_v59 = vadd.f32 %v659_v7, %v647_v50  ;;  %v518_v42 = vmul.f32 %v1815_v25, %v466_v3  ;;  %v519_v20 = vmul.f32 %v1815_v25, %v443_v10  ;;  %v599_v18 = vrot.slane %v419_v37, 1 }
 0x110   : > { %v507_v7 = vadd.f32 %v499_v15, %v479_v14  ;;  %v539_v63 = vmul.f32 %v1828_v35, %v1874_v62  ;;  %v668_v26 = vadd.f32 %v660_v60, %v648_v16  ;;  %v578_v13 = vmul.f32 %v1838_v40, %v418_v36 }
 0x111   : > { %v687_v8 = vadd.f32 %v679_v51, %v667_v59  ;;  %v526_v58 = vadd.f32 %v518_v42, %v506_v6  ;;  %v559_v24 = vmul.f32 %v1836_v39, %v1959_v19  ;;  %v641_v12 = vmul.f32 %v1846_v47, %v1973_v22 }
 0x112   : > { %v527_v23 = vadd.f32 %v519_v20, %v507_v7  ;;  %v688_v57 = vadd.f32 %v680_v2, %v668_v26  ;;  %v606_v35 = vsel %vm600_vm2, %v593_v17, %v599_v18  ;;  %v579_v28 = vmul.f32 %v1838_v40, %v419_v37 }
 0x113   : > { %v702_v61 = vadd.f32 %v1934_v53, %v687_v8  ;;  %v546_v27 = vadd.f32 %v538_v9, %v526_v58  ;;  %v612_v0 = vsel %vm600_vm2, %v599_v18, %v593_v17  ;;  %v661_v39 = vmul.f32 %v1859_v55, %v2030_v21 }
 0x114   : > { %v547_v62 = vadd.f32 %v539_v63, %v527_v23  ;;  %v703_v31 = vadd.f32 %v1934_v53, %v688_v57  ;;  %v642_v22 = vmul.f32 %v1846_v47, %v1986_v41  ;;  %v681_v36 = vmul.f32 %v1885_v4, %v606_v35 }
 0x115   : > { %710 = vst [vmem:[%s1968_s7 + $0x20] sm:$0xff] %v702_v61  ;;  %v566_v25 = vadd.f32 %v558_v52, %v546_v27  ;;  %v630_v40 = vsel %vm614_vm3, %v612_v0, 0.0  ;;  %v662_v37 = vmul.f32 %v1859_v55, %v628_v30 }
 0x116   : > { %v567_v19 = vadd.f32 %v559_v24, %v547_v62  ;;  %711 = vst [vmem:[%s1968_s7 + $0x28] sm:$0xff] %v703_v31  ;;  %v682_v44 = vmul.f32 %v1885_v4, %v630_v40 }
 0x117   : > { %v586_v33 = vadd.f32 %v578_v13, %v566_v25 }
 0x118   : > { %v587_v1 = vadd.f32 %v579_v28, %v567_v19 }
 0x119   : > { %v649_v34 = vadd.f32 %v641_v12, %v586_v33 }
 0x11a   : > { %v650_v43 = vadd.f32 %v642_v22, %v587_v1 }
 0x11b   : > { %v669_v21 = vadd.f32 %v661_v39, %v649_v34 }
 0x11c   : > { %v670_v41 = vadd.f32 %v662_v37, %v650_v43 }
 0x11d   : > { %v689_v47 = vadd.f32 %v681_v36, %v669_v21 }
 0x11e   : > { %v690_v11 = vadd.f32 %v682_v44, %v670_v41 }
 0x11f   : > { %v704_v56 = vadd.f32 %v1934_v53, %v689_v47 }
 0x120   : > { %v705_v55 = vadd.f32 %v1934_v53, %v690_v11 }
 0x121   : > { %712 = vst [vmem:[%s1968_s7 + $0x30] sm:$0xff] %v704_v56 }
 0x122   : > { %713 = vst [vmem:[%s1968_s7 + $0x38] sm:$0xff] %v705_v55 }
 0x123   : > { %1206 = shalt.err (!%p1203_p0)
}
 0x124   : > { %s1207_s28 = scalar_lea.hbm %s2108_s18, 1024  ;;  %s1211_s21 = scalar_lea.hbm %s2284_s15, 8192 }
 0x125   : > { %p1208_p9 = scmp.ne.s32.totalorder %s2108_s18, %s1207_s28  ;;  %p1212_p10 = scmp.lt.u32.totalorder %s2108_s18, %s2284_s15 }
 0x126   : > { %p1213_p7 = scmp.lt.u32.totalorder %s1211_s21, %s1207_s28  ;;  %p1215_p13 = scmp.lt.u32.totalorder %s1207_s28, %s2108_s18 }
 0x127   : > { %p1209_p5 = pnand %p1208_p9, %p2285_p12 }
 0x128   : > { %p1214_p1 = por %p1213_p7, %p1212_p10 }
 0x129   : > { %p1210_p4 = pneg %p1209_p5 }
 0x12a   : > { %p1216_p8 = por %p1215_p13, %p1214_p1 }
 0x12c   : > { %p1217_p11 = pnand %p1216_p8, %p1210_p4 }
 0x12e   : > { %1220 = shalt.err (!%p1217_p11)
}
 0x12f   : > { %s1360_s20 = smov 128   ;;  %s1361_s30 = smov 8  }
 0x130   : > { %934 = dma.vmem_to_hbm [thread:$0]  (%p2285_p12), %s2101_s0, 1024, %s2108_s18, %s715_s4, %s1360_s20, %s1360_s20, %s1361_s30  }
 0x131 PF: > { %s2286_s9 = sld [smem:[#allocation31_spill]]  ;;  %p957_p6 = scmp.ge.s32.totalorder %s1351_s6, 2 }
 0x132   : > { %s746_s1 = sand.u32 1, %s1323_s24  }
 0x133   : > { %s747_s11 = scalar_lea.sflag [#allocation4], %s746_s1 }
 0x137   : > { %p2287_p2 = scmp.ne.s32.totalorder %s2286_s9, 0 }
 0x139   : > { %p951_p3 = pnand %p957_p6, %p2287_p2 }
 0x13b   : > { %1294 = dma.done.wait (!%p951_p3), %s747_s11, 1024  }
 0x13c   : > { %1296 = vsyncadd (!%p951_p3), %s747_s11, 4294966272  ;;  %s25_s6 = sadd.s32 1, %s1351_s6   ;;  %s2289_s18 = sld [smem:[#allocation17_spill]] }
 0x13d   : > { %p2140_p0 = scmp.ge.s32.totalorder %s25_s6, 10   ;;  %s2290_s19 = sld [smem:[#allocation18_spill]] }
 0x13e   : > { %s2291_s17 = sld [smem:[#allocation19_spill]]  ;;  %s2292_s23 = sld [smem:[#allocation29_spill]] }
 0x13f   : > { %s2293_s13 = sld [smem:[#allocation20_spill]]  ;;  %s2294_s26 = sld [smem:[#allocation30_spill]] }
 0x140   : > { %s2295_s27 = sld [smem:[#allocation23_spill]]  ;;  %s2296_s28 = sld [smem:[#allocation24_spill]] }
 0x141   : > { %s2297_s29 = sld [smem:[#allocation25_spill]]  ;;  %s2298_s30 = sld [smem:[#allocation26_spill]] }
 0x142   : > { %s2299_s20 = smov %s2319_s12  ;;  %s2300_s21 = smov %s1315_s22 }
 0x143   : > { %s2302_s24 = smov %s1327_s25  ;;  %24 = sbr.rel (!%p2140_p0) target bundleno = 20 (0x14), region = 113 }
 0x144   : > { %s2301_s22 = smov %s2291_s17 }
 0x145   : > { %s2303_s25 = smov %s2293_s13 }
 0x14a   :  { %752 = vsyncpa [#allocation3], 1 }
 0x14b   :  { %754 = vsyncpa [#allocation3 + $0x1], 1 }
 0x14c   :  { %755 = vsyncpa [#allocation6], 1 }
 0x14d   :  { %757 = vsyncpa [#allocation6 + $0x1], 1 }
 0x14e   :  { %758 = vsyncpa [#allocation9], 1 }
 0x14f   :  { %759 = vsyncpa [#allocation4], 1 }
 0x150   :  { %761 = vsyncpa [#allocation4 + $0x1], 1 }

</bundles_post_ra>
